<compile_context>
chip_gen: v5e
topology: v5e:2x2
jax: 0.10.0
libtpu: 0.0.40
codegen_flags: <defaults>
</compile_context>

<pallas_src>
import jax
import jax.numpy as jnp
from jax.experimental import pallas as pl
from jax.experimental.pallas import tpu as pltpu

NEG_SLOPE = 0.01  # nn.LeakyReLU() default


def _vmem_capacity_bytes() -> int:
    """Physical VMEM of the local TPU; fall back to v7x's 64 MiB (smallest)."""
    try:
        info = pltpu.get_tpu_info()
        cap = getattr(info, "vmem_capacity_bytes", None)
        if cap:
            return int(cap)
    except Exception:
        pass
    return 64 * 1024 * 1024


def _choose_tiles(B, N, feat_w, f_out, adj_bytes, feat_bytes, vmem_cap):
    """Pick (bb, tm): batches per step and adjacency row-tile, with full VMEM accounting."""
    budget = int(0.60 * vmem_cap)

    def footprint(bb, tm):
        adj = 2 * bb * tm * N * adj_bytes               # double-buffered adj tile
        xin = 2 * bb * N * feat_w * feat_bytes          # double-buffered feature block
        out = 2 * bb * tm * f_out * 4                   # double-buffered output block
        wgt = 2 * (feat_w * f_out * 4 + f_out * 4)      # weight + bias (default 2 bufs)
        tmp = bb * tm * (feat_w + 2 * f_out) * 4        # in-kernel f32 temporaries
        return adj + xin + out + wgt + tmp

    # Bigger row tiles on 128 MiB parts (v5e/v6e); keep 1024 cap on v7x's 64 MiB.
    tm_cap = 2048 if vmem_cap > (96 << 20) else 1024

    if N <= 256:
        tm = N
    else:
        tm = min(N, tm_cap)
        tm = max(16, (tm // 16) * 16)
        while tm > 16 and footprint(1, tm) > budget:
            tm -= 16
        # Prefer a divisor of N (no ragged tail) but NEVER fall back to tm = N:
        # one partially-masked tail block is far cheaper than blowing VMEM.
        t = tm
        while t > 16 and N % t != 0:
            t -= 16
        if N % t == 0 and t >= max(256, tm // 2):
            tm = t

    if tm >= 256:
        bb = 1
    else:
        # Pack batches so one step carries ~256 aggregated rows (fills the MXU M
        # dim and amortizes the ~0.35 us per-step overhead on tiny problems).
        bb = min(B, max(1, 256 // max(tm, 1)))
        while bb > 1 and (B % bb != 0 or footprint(bb, tm) > budget):
            bb -= 1
    return bb, tm


def _make_kernel(mode):
    def _inv_deg(adj):
        # f32 accumulation regardless of the streamed adj dtype (exact for 0/1).
        deg = jnp.sum(adj, axis=-1, keepdims=True, dtype=jnp.float32)
        return 1.0 / deg  # matches torch (diag of reciprocals, then bmm)

    def _finish(h, b_ref, o_ref):
        h = h + b_ref[...]
        o_ref[...] = jnp.where(h >= 0, h, NEG_SLOPE * h).astype(o_ref.dtype)

    if mode == "agg_first":
        # h = ((adj @ x) * inv_deg) @ W     (cheaper when F_in <= F_out)
        def kernel(adj_ref, x_ref, w_ref, b_ref, o_ref):
            adj = adj_ref[...]                       # streamed dtype, no copy/cast
            inv_deg = _inv_deg(adj)
            agg = jnp.einsum("bmn,bnf->bmf", adj, x_ref[...],
                             preferred_element_type=jnp.float32)
            h = jnp.einsum("bmf,fo->bmo", agg * inv_deg, w_ref[...],
                           preferred_element_type=jnp.float32)
            _finish(h, b_ref, o_ref)

    elif mode == "proj_in_kernel":
        # Single row tile per batch block: project once in-kernel, then aggregate.
        def kernel(adj_ref, x_ref, w_ref, b_ref, o_ref):
            adj = adj_ref[...]
            inv_deg = _inv_deg(adj)
            xw = jnp.einsum("bnf,fo->bno", x_ref[...], w_ref[...],
                            preferred_element_type=jnp.float32)
            xw = xw.astype(adj.dtype)                # keep the big adj operand native
            h = jnp.einsum("bmn,bno->bmo", adj, xw,
                           preferred_element_type=jnp.float32) * inv_deg
            _finish(h, b_ref, o_ref)

    else:  # "pre_projected": x @ W computed once outside (not once per row tile)
        def kernel(adj_ref, xw_ref, b_ref, o_ref):
            adj = adj_ref[...]
            inv_deg = _inv_deg(adj)
            h = jnp.einsum("bmn,bno->bmo", adj, xw_ref[...],
                           preferred_element_type=jnp.float32) * inv_deg
            _finish(h, b_ref, o_ref)

    return kernel


def convolution_layer(node_mat, adj_mat, weight_t, bias):
    """node_mat: (B, N, F_in), adj_mat: (B, N, N) (f32, or bf16 pre-converted once
    per graph by the caller for multi-layer GNNs), weight_t: (F_in, F_out),
    bias: (F_out,).  Returns f32 (B, N, F_out)."""
    B, N, F_in = node_mat.shape
    F_out = weight_t.shape[1]

    vmem_cap = _vmem_capacity_bytes()
    adj_bytes = adj_mat.dtype.itemsize
    low_precision = adj_mat.dtype != jnp.float32
    feat_dtype = adj_mat.dtype if low_precision else jnp.float32
    feat_bytes = jnp.dtype(feat_dtype).itemsize

    w_f32 = weight_t.astype(jnp.float32)
    b_2d = bias.astype(jnp.float32).reshape(1, F_out)

    # Conservative feature width (pre-projected features are narrower than F_in).
    bb, tm = _choose_tiles(B, N, F_in, F_out, adj_bytes, feat_bytes, vmem_cap)
    grid_b = B // bb
    grid_m = pl.cdiv(N, tm)
    grid = (grid_b, grid_m)

    if F_in <= F_out:
        mode = "agg_first"
    elif grid_m == 1:
        mode = "proj_in_kernel"
    else:
        mode = "pre_projected"

    adj_spec = pl.BlockSpec((bb, tm, N), lambda b, m: (b, m, 0))
    out_spec = pl.BlockSpec((bb, tm, F_out), lambda b, m: (b, m, 0))
    w_spec = pl.BlockSpec((F_in, F_out), lambda b, m: (0, 0))
    b_spec = pl.BlockSpec((1, F_out), lambda b, m: (0, 0))

    if mode == "pre_projected":
        # One plain XLA matmul per call; the kernel only aggregates (no per-m-tile
        # recomputation of x @ W).
        feat = jnp.einsum("bnf,fo->bno", node_mat.astype(jnp.float32), w_f32)
        feat = feat.astype(feat_dtype)
        feat_width = F_out
        in_specs = [adj_spec,
                    pl.BlockSpec((bb, N, F_out), lambda b, m: (b, 0, 0)),
                    b_spec]
        inputs = (adj_mat, feat, b_2d)
    else:
        # Small feature operand matches the adjacency's streamed dtype so the big
        # adj tile never gets promoted/copied in-kernel.
        feat = node_mat.astype(feat_dtype)
        feat_width = F_in
        in_specs = [adj_spec,
                    pl.BlockSpec((bb, N, F_in), lambda b, m: (b, 0, 0)),
                    w_spec, b_spec]
        inputs = (adj_mat, feat, w_f32, b_2d)

    # Cost hint so XLA can schedule neighbors around this HBM-bound call.
    agg_width = F_in if mode == "agg_first" else F_out
    flops = 2 * B * N * N * agg_width
    if mode != "pre_projected":
        flops += 2 * B * N * F_in * F_out
    bytes_accessed = (B * N * N * adj_bytes
                      + B * N * feat_width * feat_bytes
                      + B * N * F_out * 4
                      + F_in * F_out * 4 + F_out * 4)
    cost = pl.CostEstimate(flops=flops, transcendentals=0,
                           bytes_accessed=bytes_accessed)

    # Shard the batch axis across TensorCores when possible (keeps each core's
    # resident feature block unique); only fall back to parallel-m when there is
    # a single batch step.
    dims = ("parallel", "arbitrary") if grid_b >= 2 else ("parallel", "parallel")

    return pl.pallas_call(
        _make_kernel(mode),
        out_shape=jax.ShapeDtypeStruct((B, N, F_out), jnp.float32),
        grid_spec=pltpu.PrefetchScalarGridSpec(
            num_scalar_prefetch=0,
            grid=grid,
            in_specs=in_specs,
            out_specs=out_spec,
        ),
        compiler_params=pltpu.CompilerParams(
            dimension_semantics=dims,
            vmem_limit_bytes=int(0.75 * vmem_cap),
        ),
        cost_estimate=cost,
    )(*inputs)


def reference(node_mat, adj_mat, weight_t, bias):
    deg = jnp.sum(adj_mat, axis=-1, keepdims=True)
    agg = jnp.einsum("bij,bjf->bif", adj_mat, node_mat) / deg
    h = jnp.einsum("bnf,fo->bno", agg, weight_t) + bias
    return jnp.where(h >= 0, h, NEG_SLOPE * h)


if __name__ == "__main__":
    key = jax.random.PRNGKey(0)
    B, N, F_in, F_out = 2, 16, 8, 32

    k1, k2, k3, k4 = jax.random.split(key, 4)

    node_mat = jax.random.normal(k1, (B, N, F_in), dtype=jnp.float32)

    # Symmetric 0/1 adjacency with self-loops so every node has >= 1 neighbor.
    a = (jax.random.uniform(k2, (B, N, N)) > 0.5).astype(jnp.float32)
    adj_mat = jnp.clip(a + jnp.transpose(a, (0, 2, 1)) + jnp.eye(N), 0.0, 1.0)

    # Deterministic Linear params (Kaiming-uniform-ish range, like nn.Linear init).
    bound = 1.0 / (F_in ** 0.5)
    weight_t = jax.random.uniform(k3, (F_in, F_out), minval=-bound, maxval=bound,
                                  dtype=jnp.float32)
    bias = jax.random.uniform(k4, (F_out,), minval=-bound, maxval=bound,
                              dtype=jnp.float32)

    out = convolution_layer(node_mat, adj_mat, weight_t, bias)
    jax.block_until_ready(out)

    ref = reference(node_mat, adj_mat, weight_t, bias)
    assert out.shape == (B, N, F_out)
    assert jnp.allclose(out, ref, atol=1e-5, rtol=1e-5)

    print("KERNEL_OK")
</pallas_src>

<mosaic_0001>
module attributes {stable_mosaic.version = 11 : i64} {
  func.func @kernel(%arg0: i32, %arg1: i32, %arg2: memref<2x16x16xf32, #tpu.memory_space<vmem>>, %arg3: memref<2x16x8xf32, #tpu.memory_space<vmem>>, %arg4: memref<8x32xf32, #tpu.memory_space<vmem>>, %arg5: memref<1x32xf32, #tpu.memory_space<vmem>>, %arg6: memref<2x16x32xf32, #tpu.memory_space<vmem>>) attributes {dimension_semantics = [#tpu.dimension_semantics<parallel>, #tpu.dimension_semantics<parallel>], iteration_bounds = array<i64: 1, 1>, scalar_prefetch = 0 : i64, scratch_operands = 0 : i64, tpu.core_type = #tpu.core_type<tc>, window_params = [{transform_indices = @transform_0, window_bounds = array<i64: 2, 16, 16>}, {transform_indices = @transform_1, window_bounds = array<i64: 2, 16, 8>}, {pipeline_mode = #tpu.pipeline_mode<synchronous>, transform_indices = @transform_2, window_bounds = array<i64: 8, 32>}, {pipeline_mode = #tpu.pipeline_mode<synchronous>, transform_indices = @transform_3, window_bounds = array<i64: 1, 32>}, {transform_indices = @transform_4, window_bounds = array<i64: 2, 16, 32>}]} {
    %c0 = arith.constant 0 : index
    %c0_0 = arith.constant 0 : index
    %c0_1 = arith.constant 0 : index
    %0 = vector.load %arg2[%c0, %c0_0, %c0_1] : memref<2x16x16xf32, #tpu.memory_space<vmem>>, vector<2x16x16xf32>
    %cst = arith.constant dense<0.000000e+00> : vector<2x16xf32>
    %1 = vector.multi_reduction <add>, %0, %cst [2] : vector<2x16x16xf32> to vector<2x16xf32>
    %2 = vector.shape_cast %1 : vector<2x16xf32> to vector<2x16x1xf32>
    %cst_2 = arith.constant 1.000000e+00 : f32
    %3 = vector.broadcast %cst_2 : f32 to vector<2x16x1xf32>
    %4 = arith.divf %3, %2 : vector<2x16x1xf32>
    %c0_3 = arith.constant 0 : index
    %c0_4 = arith.constant 0 : index
    %c0_5 = arith.constant 0 : index
    %5 = vector.load %arg3[%c0_3, %c0_4, %c0_5] : memref<2x16x8xf32, #tpu.memory_space<vmem>>, vector<2x16x8xf32>
    "tpu.trace_start"() <{level = 10 : i32, message = "bmn,bnf->bmf"}> : () -> ()
    %cst_6 = arith.constant dense<0.000000e+00> : vector<2x16x8xf32>
    %6 = tpu.matmul %0, %5, %cst_6 {dimension_numbers = #tpu.dot_dimension_numbers<[2], [1], [1], [2], [0, 0, 0, 1, 1, 2], [0], [0]>} : vector<2x16x16xf32>, vector<2x16x8xf32>, vector<2x16x8xf32> -> vector<2x16x8xf32>
    "tpu.trace_stop"() : () -> ()
    %7 = vector.broadcast %4 : vector<2x16x1xf32> to vector<2x16x8xf32>
    %8 = arith.mulf %6, %7 : vector<2x16x8xf32>
    %c0_7 = arith.constant 0 : index
    %c0_8 = arith.constant 0 : index
    %9 = vector.load %arg4[%c0_7, %c0_8] : memref<8x32xf32, #tpu.memory_space<vmem>>, vector<8x32xf32>
    "tpu.trace_start"() <{level = 10 : i32, message = "bmf,fo->bmo"}> : () -> ()
    %cst_9 = arith.constant dense<0.000000e+00> : vector<2x16x32xf32>
    %10 = tpu.matmul %8, %9, %cst_9 {dimension_numbers = #tpu.dot_dimension_numbers<[2], [0], [0, 1], [1], [0, 0, 0, 1, 1, 1], [], []>} : vector<2x16x8xf32>, vector<8x32xf32>, vector<2x16x32xf32> -> vector<2x16x32xf32>
    "tpu.trace_stop"() : () -> ()
    %c0_10 = arith.constant 0 : index
    %c0_11 = arith.constant 0 : index
    %11 = vector.load %arg5[%c0_10, %c0_11] : memref<1x32xf32, #tpu.memory_space<vmem>>, vector<1x32xf32>
    %12 = vector.shape_cast %11 : vector<1x32xf32> to vector<1x1x32xf32>
    %13 = vector.broadcast %12 : vector<1x1x32xf32> to vector<2x16x32xf32>
    %14 = arith.addf %10, %13 : vector<2x16x32xf32>
    %cst_12 = arith.constant 0.000000e+00 : f32
    %15 = vector.broadcast %cst_12 : f32 to vector<2x16x32xf32>
    %16 = arith.cmpf oge, %14, %15 : vector<2x16x32xf32>
    %cst_13 = arith.constant 0.00999999977 : f32
    %17 = vector.broadcast %cst_13 : f32 to vector<2x16x32xf32>
    %18 = arith.mulf %17, %14 : vector<2x16x32xf32>
    %19 = arith.select %16, %14, %18 : vector<2x16x32xi1>, vector<2x16x32xf32>
    %c0_14 = arith.constant 0 : index
    %c0_15 = arith.constant 0 : index
    %c0_16 = arith.constant 0 : index
    %20 = vector.load %arg6[%c0_14, %c0_15, %c0_16] : memref<2x16x32xf32, #tpu.memory_space<vmem>>, vector<2x16x32xf32>
    tpu.vector_store %arg6[%c0_14, %c0_15, %c0_16], %19 {strides = array<i32>} : memref<2x16x32xf32, #tpu.memory_space<vmem>>, vector<2x16x32xf32>,
    return
  }
  func.func @transform_0(%arg0: i32, %arg1: i32) -> (i32, i32, i32) {
    %c0_i32 = arith.constant 0 : i32
    %c0_i32_0 = arith.constant 0 : i32
    return %arg0, %arg1, %c0_i32 : i32, i32, i32
  }
  func.func @transform_1(%arg0: i32, %arg1: i32) -> (i32, i32, i32) {
    %c0_i32 = arith.constant 0 : i32
    %c0_i32_0 = arith.constant 0 : i32
    %c0_i32_1 = arith.constant 0 : i32
    return %arg0, %c0_i32, %c0_i32_0 : i32, i32, i32
  }
  func.func @transform_2(%arg0: i32, %arg1: i32) -> (i32, i32) {
    %c0_i32 = arith.constant 0 : i32
    %c0_i32_0 = arith.constant 0 : i32
    %c0_i32_1 = arith.constant 0 : i32
    return %c0_i32, %c0_i32_0 : i32, i32
  }
  func.func @transform_3(%arg0: i32, %arg1: i32) -> (i32, i32) {
    %c0_i32 = arith.constant 0 : i32
    %c0_i32_0 = arith.constant 0 : i32
    %c0_i32_1 = arith.constant 0 : i32
    return %c0_i32, %c0_i32_0 : i32, i32
  }
  func.func @transform_4(%arg0: i32, %arg1: i32) -> (i32, i32, i32) {
    %c0_i32 = arith.constant 0 : i32
    %c0_i32_0 = arith.constant 0 : i32
    return %arg0, %arg1, %c0_i32 : i32, i32, i32
  }
}

</mosaic_0001>

<bundles_post_ra>
// kernel: tpu_custom_call.1
= control target key start
LH: loop header
LB: loop body
LE: loop exit
PB: predicated region body
PF: predicated region fallthrough
CT: control target
= control target key end

     0   :  { %vm22_vm0 = vcmask 130048   ;;  %s380_s0 = inlined_call_operand.vmem [shape: f32[2,16,16], index: 0, kind: input, shape index: {}]   ;;  %s381_s1 = inlined_call_operand.vmem [shape: f32[2,16,8], index: 1, kind: input, shape index: {}]   ;;  %s382_s2 = inlined_call_operand.vmem [shape: f32[8,32], index: 2, kind: input, shape index: {}]   ;;  %s383_s3 = inlined_call_operand.vmem [shape: f32[1,32], index: 3, kind: input, shape index: {}]   ;;  %s384_s4 = inlined_call_operand.hbm [shape: f32[2,16,32], index: 4, kind: output, shape index: {}]  }
   0x1   :  { %v96_v0 = vld [vmem:[%s381_s1 + $0x8] sm:$0xff]  ;;  %v18_v2 = vld [vmem:[%s380_s0] sm:$0xff]  ;;  %v98_v6 = vld [vmem:[%s381_s1 + $0x18] sm:$0xff] }
   0x2   :  { %v19_v1 = vld [vmem:[%s380_s0 + $0x8] sm:$0xff]  ;;  %119 = vmatpush.msra.mxu0 %v96_v0  ;;  %v23_v4 = vsel %vm22_vm0, %v18_v2, 0.0  ;;  %v95_v5 = vld [vmem:[%s381_s1] sm:$0xff]  ;;  %v97_v7 = vld [vmem:[%s381_s1 + $0x10] sm:$0xff]  ;;  %148 = vmatpush.msra.mxu1 %v98_v6 }
   0x3   :  { %v26_v3 = vsel %vm22_vm0, %v19_v1, 0.0  ;;  %24 = vadd.xlane.f32.xlu1 %v23_v4  ;;  %v20_v8 = vld [vmem:[%s380_s0 + $0x10] sm:$0xff] }
   0x4   :  { %27 = vadd.xlane.f32.xlu0 %v26_v3  ;;  %120 = vmatpush.msra.mxu0 %v95_v5 }
   0x5   :  { %9 = vsyncpa [#allocation3], 0  ;;  %243 = vmatmul.msk.f32.vlgmr.msra.gmra.mxu0 %vm22_vm0, %v18_v2  ;;  %v21_v9 = vld [vmem:[%s380_s0 + $0x18] sm:$0xff]  ;;  %149 = vmatpush.msra.mxu1 %v97_v7  ;;  %v29_v10 = vsel %vm22_vm0, %v20_v8, 0.0  ;;  %v161_v12 = vld [vmem:[%s382_s2] sm:$0xff]  ;;  %vm166_vm8 = vcmask 64512  }
   0x6   :  { %245 = vmatmul.msk.f32.vlgmr.msra.gmra.mxu1 %vm22_vm0, %v20_v8  ;;  %v32_v11 = vsel %vm22_vm0, %v21_v9, 0.0  ;;  %194 = vmatpush.msra.mxu2 %v161_v12  ;;  %v255_v2 = vld [vmem:[%s383_s3] ss:$0 sm:$0xff]  ;;  %s290_s3 = smov [#allocation2]   ;;  %s231_s9 = sshll.u32 %s384_s4, 4  ;;  %s232_s9 = int_to_ptr.hbm [resolvable:$true] %s231_s9 }
   0x7   :  { %251 = vmatpush.msra.mxu3 %v161_v12  ;;  %s229_s6 = sshll.u32 %s290_s3, 4  ;;  %s291_s10 = smov 128   ;;  %s230_s6 = int_to_ptr.vmem [resolvable:$true] %s229_s6 }
   0x8   :  { %s292_s11 = smov 8  }
   0xb   :  { %33 = vadd.xlane.f32.xlu1 %v32_v11 }
   0xc   :  { %30 = vadd.xlane.f32.xlu0 %v29_v10 }
   0xd   :  { %244 = vmatmul.msk.f32.gmra.mxu0 %vm22_vm0, %v19_v1 }
   0xe   :  { %246 = vmatmul.msk.f32.gmra.mxu1 %vm22_vm0, %v21_v9 }
  0x76   :  { %v25_v14 = vpop.xlane.xlu1 %24 }
  0x77   :  { %v28_v13 = vpop.xlane.xlu0 %27  ;;  %v46_v22 = vand.u32 2147483648, %v25_v14  ;;  %vm40_vm2 = vweird.f32 %v25_v14  ;;  %v44_v27 = vand.u32 2147483647, %v25_v14 }
  0x78   :  { %256 = vrcp.f32 %v28_v13  ;;  %vm55_vm4 = vweird.f32 %v28_v13  ;;  %v61_v30 = vand.u32 2147483648, %v28_v13  ;;  %v59_v34 = vand.u32 2147483647, %v28_v13 }
  0x79   :  { %258 = vrcp.f32 %v25_v14  ;;  %v47_v28 = vor.u32 1.1754944e-38, %v46_v22  ;;  %vm45_vm7 = vcmp.eq.f32.partialorder %v44_v27, 8.507059e+37 }
  0x7a   :  { %v62_v42 = vor.u32 1.1754944e-38, %v61_v30  ;;  %vm60_vm9 = vcmp.eq.f32.partialorder %v59_v34, 8.507059e+37 }
  0x7e   :  { %v257_v15 = vpop.eup %256  ;;  %v353_v19 = vpop.xlane.xlu1 %33 }
  0x7f   :  { %v259_v16 = vpop.eup %258  ;;  %v51_v17 = vmul.f32 %v257_v15, %v28_v13  ;;  %v31_v18 = vpop.xlane.xlu0 %30  ;;  %vm56_vm1 = vweird.f32 %v257_v15  ;;  %v91_v56 = vand.u32 2147483648, %v353_v19  ;;  %vm85_vm14 = vweird.f32 %v353_v19 }
  0x80   :  { %v36_v20 = vmul.f32 %v259_v16, %v25_v14  ;;  %260 = vrcp.f32 %v31_v18  ;;  %vm41_vm3 = vweird.f32 %v259_v16  ;;  %vm356_vm5 = vmor %vm55_vm4, %vm56_vm1  ;;  %v76_v46 = vand.u32 2147483648, %v31_v18 }
  0x81   :  { %v52_v21 = vsub.f32 1.0, %v51_v17  ;;  %262 = vrcp.f32 %v353_v19  ;;  %vm42_vm6 = vmor %vm40_vm2, %vm41_vm3  ;;  %v74_v49 = vand.u32 2147483647, %v31_v18  ;;  %vm70_vm11 = vweird.f32 %v31_v18 }
  0x82   :  { %v37_v23 = vsub.f32 1.0, %v36_v20  ;;  %v122_v24 = vpop.f32.mrf.mxu0  ;;  %v77_v54 = vor.u32 1.1754944e-38, %v76_v46  ;;  %v89_v60 = vand.u32 2147483647, %v353_v19  ;;  %v92_v61 = vor.u32 1.1754944e-38, %v91_v56 }
  0x83   :  { %v53_v25 = vmul.f32 %v257_v15, %v52_v21  ;;  %v151_v55 = vpop.f32.mrf.mxu1  ;;  %vm75_vm13 = vcmp.eq.f32.partialorder %v74_v49, 8.507059e+37  ;;  %vm220_vm3 = vcmask 261120  }
  0x84   :  { %v38_v26 = vmul.f32 %v259_v16, %v37_v23  ;;  %vm90_vm1 = vcmp.eq.f32.partialorder %v89_v60, 8.507059e+37 }
  0x85   :  { %v54_v29 = vadd.f32 %v257_v15, %v53_v25 }
  0x86   :  { %v261_v31 = vpop.eup %260  ;;  %v39_v32 = vadd.f32 %v259_v16, %v38_v26 }
  0x87   :  { %v263_v35 = vpop.eup %262  ;;  %v66_v36 = vmul.f32 %v261_v31, %v31_v18  ;;  %v58_v39 = vsel %vm356_vm5, %v257_v15, %v54_v29  ;;  %vm71_vm10 = vweird.f32 %v261_v31 }
  0x88   :  { %v81_v37 = vmul.f32 %v263_v35, %v353_v19  ;;  %v43_v38 = vsel %vm42_vm6, %v259_v16, %v39_v32  ;;  %v63_v47 = vsel %vm60_vm9, %v62_v42, %v58_v39  ;;  %vm72_vm12 = vmor %vm70_vm11, %vm71_vm10  ;;  %vm86_vm15 = vweird.f32 %v263_v35 }
  0x89   :  { %v67_v40 = vsub.f32 1.0, %v66_v36  ;;  %v48_v41 = vsel %vm45_vm7, %v47_v28, %v43_v38  ;;  %vm87_vm0 = vmor %vm85_vm14, %vm86_vm15 }
  0x8a   :  { %v82_v43 = vsub.f32 1.0, %v81_v37  ;;  %v157_v44 = vmul.f32 %v122_v24, %v48_v41  ;;  %v125_v48 = vpop.f32.mrf.mxu0 }
  0x8b   :  { %v68_v45 = vmul.f32 %v261_v31, %v67_v40  ;;  %v158_v50 = vmul.f32 %v125_v48, %v63_v47  ;;  %v154_v0 = vpop.f32.mrf.mxu1 }
  0x8c   :  { %247 = vmatmul.msk.f32.vlgmr.msra.gmra.mxu2 %vm166_vm8, %v157_v44  ;;  %v83_v52 = vmul.f32 %v263_v35, %v82_v43 }
  0x8d   :  { %v69_v51 = vadd.f32 %v261_v31, %v68_v45  ;;  %248 = vmatmul.msk.f32.vlgmr.msra.gmra.mxu3 %vm166_vm8, %v158_v50 }
  0x8e   :  { %v84_v58 = vadd.f32 %v263_v35, %v83_v52 }
  0x8f   :  { %v73_v53 = vsel %vm72_vm12, %v261_v31, %v69_v51 }
  0x90   :  { %v78_v57 = vsel %vm75_vm13, %v77_v54, %v73_v53  ;;  %v88_v62 = vsel %vm87_vm0, %v263_v35, %v84_v58 }
  0x91   :  { %v159_v59 = vmul.f32 %v151_v55, %v78_v57  ;;  %v93_v63 = vsel %vm90_vm1, %v92_v61, %v88_v62 }
  0x92   :  { %v160_v1 = vmul.f32 %v154_v0, %v93_v63 }
  0x95   :  { %249 = vmatmul.msk.f32.gmra.mxu3 %vm166_vm8, %v159_v59 }
  0x9d   :  { %250 = vmatmul.msk.f32.gmra.mxu3 %vm166_vm8, %v160_v1 }
 0x10f   :  { %v196_v3 = vpop.f32.mrf.mxu2 }
 0x110   :  { %v197_v4 = vadd.f32 %v255_v2, %v196_v3  ;;  %v199_v5 = vpop.f32.mrf.mxu3 }
 0x111   :  { %v200_v7 = vadd.f32 %v255_v2, %v199_v5 }
 0x112   :  { %vm208_vm2 = vcmp.ge.f32.partialorder %v197_v4, 0.0  ;;  %v212_v6 = vmul.f32 0.01, %v197_v4 }
 0x113   :  { %vm209_vm4 = vcmp.ge.f32.partialorder %v200_v7, 0.0  ;;  %v213_v9 = vmul.f32 0.01, %v200_v7 }
 0x114   :  { %v216_v8 = vsel %vm208_vm2, %v197_v4, %v212_v6 }
 0x115   :  { %221 = vst.msk [vmem:[#allocation2] sm:$0xff] %vm220_vm3, %v216_v8  ;;  %v217_v10 = vsel %vm209_vm4, %v200_v7, %v213_v9 }
 0x116   :  { %222 = vst.msk [vmem:[#allocation2 + $0x8] sm:$0xff] %vm220_vm3, %v217_v10 }
 0x118   :  { %v202_v11 = vpop.f32.mrf.mxu3 }
 0x119   :  { %v203_v12 = vadd.f32 %v255_v2, %v202_v11 }
 0x11b   :  { %vm210_vm5 = vcmp.ge.f32.partialorder %v203_v12, 0.0  ;;  %v214_v13 = vmul.f32 0.01, %v203_v12 }
 0x11d   :  { %v218_v14 = vsel %vm210_vm5, %v203_v12, %v214_v13 }
 0x11e   :  { %223 = vst.msk [vmem:[#allocation2 + $0x10] sm:$0xff] %vm220_vm3, %v218_v14 }
 0x120   :  { %v205_v15 = vpop.f32.mrf.mxu3 }
 0x121   :  { %v206_v16 = vadd.f32 %v255_v2, %v205_v15 }
 0x123   :  { %vm211_vm6 = vcmp.ge.f32.partialorder %v206_v16, 0.0  ;;  %v215_v17 = vmul.f32 0.01, %v206_v16 }
 0x125   :  { %v219_v18 = vsel %vm211_vm6, %v206_v16, %v215_v17 }
 0x126   :  { %224 = vst.msk [vmem:[#allocation2 + $0x18] sm:$0xff] %vm220_vm3, %v219_v18 }
 0x127   :  { %237 = dma.vmem_to_hbm [thread:$0]  %s230_s6, 512, %s232_s9, [#allocation3], %s291_s10, %s291_s10, %s292_s11  }
 0x128   :  { %288 = dma.done.wait [#allocation3], 512  }
 0x129   :  { %289 = vsyncadd [#allocation3], 4294966784 }
 0x12a   :  { %242 = vsyncpa [#allocation3], 1 }

</bundles_post_ra>
